<compile_context>
chip_gen: v7x
topology: tpu7x:2x2x1
jax: 0.10.0
libtpu: 0.0.40
codegen_flags: <defaults>
</compile_context>

<pallas_src>
import functools

import jax
import jax.numpy as jnp
from jax import lax
from jax.experimental import pallas as pl
from jax.experimental.pallas import tpu as pltpu


def _fold_line_weights(wdw, wpw_scaled, W_in, W_out, S, P):
    """Fold depthwise W-taps (+ W zero-padding) and the 1x1 conv (+ BN scale, already
    folded into wpw_scaled) into per-dh matrices.

    Returns A with shape (K, W_in*C_in, W_out*C_out) such that
      out[b, h, w*C_out + co] = sum_dh  in_rows_dh[b, h, :] @ A[dh]
    where in_rows_dh is the (W-unpadded) input row slab for row-shift dh.
    """
    K, _, C_in = wdw.shape
    C_out = wpw_scaled.shape[1]
    # M[dh, wi, wo, ci] = wdw[dh, dw, ci] where wi == wo*S + dw - P and 0 <= wi < W_in
    M = jnp.zeros((K, W_in, W_out, C_in), jnp.float32)
    wo = jnp.arange(W_out)
    for dw in range(K):
        wi = wo * S + dw - P
        valid = (wi >= 0) & (wi < W_in)
        wi_c = jnp.clip(wi, 0, W_in - 1)
        upd = jnp.where(valid[None, :, None], wdw[:, dw, None, :], 0.0)  # (K, W_out, C_in)
        M = M.at[:, wi_c, wo, :].add(upd)
    # A[dh, wi*C_in+ci, wo*C_out+co] = M[dh, wi, wo, ci] * wpw_scaled[ci, co]
    A = jnp.einsum('kiwc,cd->kicwd', M, wpw_scaled)  # (K, W_in, C_in, W_out, C_out)
    return A.reshape(K, W_in * C_in, W_out * C_out)


def _parallel_grid_steps():
    """How many 'parallel' grid steps to aim for.

    v5e / v6e have a single TensorCore: grid steps are a serial loop, so one fat
    step (all batch folded into the matmul M dim) beats two half-size steps.
    v7x (2 TCs) and v4/v5p (megacore) benefit from >=2 parallel steps.
    """
    try:
        kind = jax.devices()[0].device_kind.lower()
    except Exception:
        return 1
    if any(t in kind for t in ("v5e", "v6e", "lite")):
        return 1
    return 2


def make_sepconv_kernel(K, S, P, H1, H2, compute_dtype):
    """Fused SepConv kernel body for fixed static dims (activations in (B, H, W*C))."""
    H1v = H1 + 2 * P  # stage-1 output rows incl. the stage-2 H-halo (zero) rows

    def kernel(x_ref, a1_ref, b1_ref, a2_ref, b2_ref, o_ref):
        B, _, WC = x_ref.shape
        W1C = a1_ref.shape[2]
        W2Co = a2_ref.shape[2]

        a1 = a1_ref[...]                         # hoisted weight loads (bf16 or f32)
        a2 = a2_ref[...]

        # ---- stage 1: depthwise W-taps + 1x1 conv + BN1 scale folded into a1[dh] (MXU) ----
        acc1 = jnp.zeros((B * H1v, W1C), jnp.float32)
        if S == 1:
            x = jnp.maximum(x_ref[...], 0.0)     # ReLU in f32 (padded rows stay zero)
            for dh in range(K):                  # short static unroll
                rows = x[:, dh:dh + H1v, :].reshape(B * H1v, WC).astype(compute_dtype)
                acc1 = acc1 + jnp.dot(rows, a1[dh],
                                      preferred_element_type=jnp.float32)
        else:
            # strided ref load: only pull the rows actually used for this dh
            for dh in range(K):
                rows = x_ref[:, pl.ds(dh, H1v, stride=S), :]
                rows = jnp.maximum(rows, 0.0).reshape(B * H1v, WC).astype(compute_dtype)
                acc1 = acc1 + jnp.dot(rows, a1[dh],
                                      preferred_element_type=jnp.float32)

        y1 = jnp.maximum(acc1 + b1_ref[...], 0.0).reshape(B, H1v, W1C)  # BN1 bias + ReLU
        # rows [0,P) and [P+H1, H1v) are exactly the stage-2 zero H-padding -> mask them
        # (per-row predicate built at (1, H1v, 1) and broadcast; no full-size int32 iota)
        r = lax.broadcasted_iota(jnp.int32, (1, H1v, 1), 1)
        y1 = jnp.where((r >= P) & (r < P + H1), y1, 0.0)

        # ---- stage 2: depthwise W-taps + 1x1 conv + BN2 scale folded into a2[dh] (MXU) ----
        acc2 = jnp.zeros((B * H2, W2Co), jnp.float32)
        for dh in range(K):
            rows2 = y1[:, dh:dh + H2, :].reshape(B * H2, W1C).astype(compute_dtype)
            acc2 = acc2 + jnp.dot(rows2, a2[dh],
                                  preferred_element_type=jnp.float32)
        # lane-dense output store: last dim = W2*C_out (128 for the demo shapes)
        o_ref[...] = (acc2 + b2_ref[...]).reshape(B, H2, W2Co).astype(o_ref.dtype)

    return kernel


def sepconv_forward(x_in, params, *, kernel_size, stride, padding,
                    batch_block=None, use_bf16=True, data_format="NCHW"):
    """Pallas SepConv forward.

    x_in: (N, C_in, H, W) if data_format == "NCHW" (PyTorch semantics, default) or
          (N, H, W, C_in) if data_format == "NHWC" (skips both wrapper transposes).
    Returns the same layout it was given.
    """
    (wdw1, wpw1, g1, beta1, m1, v1,
     wdw2, wpw2, g2, beta2, m2, v2) = params
    eps = 1e-5

    if data_format == "NCHW":
        x_nhwc = jnp.transpose(x_in, (0, 2, 3, 1))
    elif data_format == "NHWC":
        x_nhwc = x_in
    else:
        raise ValueError(data_format)

    N, H, W, C_in = x_nhwc.shape
    C_out = wpw2.shape[1]
    K, S, P = kernel_size, stride, padding
    H1 = (H + 2 * P - K) // S + 1
    W1 = (W + 2 * P - K) // S + 1
    H2 = H1 + 2 * P - K + 1
    W2 = W1 + 2 * P - K + 1

    compute_dtype = jnp.bfloat16 if use_bf16 else jnp.float32

    # ---- fold BN (running stats) scale into the pointwise weights; keep only a bias ----
    s1 = g1 / jnp.sqrt(v1 + eps)
    b1c = beta1 - m1 * s1
    s2 = g2 / jnp.sqrt(v2 + eps)
    b2c = beta2 - m2 * s2
    wpw1s = wpw1 * s1[None, :]
    wpw2s = wpw2 * s2[None, :]

    # ---- fold depthwise W-taps + W zero-padding + 1x1 conv into per-dh matrices ----
    # Cast to bf16 (MXU-native on all three chips); f32 accumulation stays in-kernel.
    A1 = _fold_line_weights(wdw1, wpw1s, W, W1, S, P).astype(compute_dtype)   # (K, W*C_in,  W1*C_in)
    A2 = _fold_line_weights(wdw2, wpw2s, W1, W2, 1, P).astype(compute_dtype)  # (K, W1*C_in, W2*C_out)
    b1t = jnp.tile(b1c, W1)[None, :].astype(jnp.float32)                      # (1, W1*C_in)
    b2t = jnp.tile(b2c, W2)[None, :].astype(jnp.float32)                      # (1, W2*C_out)

    # ---- input: (N, H, W*C_in) lane-dense slab; H-pad only (W pad is in A1).
    # Extra P*S rows per side let stage 1 also emit the stage-2 H-halo rows directly,
    # removing the padded-intermediate VMEM scratch round trip.
    Ptop = P * (S + 1)
    x = x_nhwc.astype(jnp.float32).reshape(N, H, W * C_in)
    x = jnp.pad(x, ((0, 0), (Ptop, Ptop), (0, 0)))
    Hp = H + 2 * Ptop

    if batch_block is None:
        # Chip-dependent: one fat step on single-TC chips (v5e/v6e), >=2 parallel
        # steps on 2-TC chips (v7x / megacore).
        steps = max(1, min(N, _parallel_grid_steps()))
        batch_block = max(1, N // steps)
    while N % batch_block:
        batch_block -= 1
    grid = (N // batch_block,)

    kernel = make_sepconv_kernel(K, S, P, H1, H2, compute_dtype)

    out_flat = pl.pallas_call(
        kernel,
        out_shape=jax.ShapeDtypeStruct((N, H2, W2 * C_out), jnp.float32),
        grid_spec=pltpu.PrefetchScalarGridSpec(
            num_scalar_prefetch=0,
            grid=grid,
            in_specs=[
                pl.BlockSpec((batch_block, Hp, W * C_in), lambda n: (n, 0, 0)),
                pl.BlockSpec((K, W * C_in, W1 * C_in), lambda n: (0, 0, 0)),
                pl.BlockSpec((1, W1 * C_in), lambda n: (0, 0)),
                pl.BlockSpec((K, W1 * C_in, W2 * C_out), lambda n: (0, 0, 0)),
                pl.BlockSpec((1, W2 * C_out), lambda n: (0, 0)),
            ],
            out_specs=pl.BlockSpec((batch_block, H2, W2 * C_out), lambda n: (n, 0, 0)),
        ),
        compiler_params=pltpu.CompilerParams(dimension_semantics=("parallel",)),
    )(x, A1, b1t, A2, b2t)

    out_nhwc = out_flat.reshape(N, H2, W2, C_out)
    if data_format == "NCHW":
        return jnp.transpose(out_nhwc, (0, 3, 1, 2))
    return out_nhwc


def sepconv_reference(x, params, *, kernel_size, stride, padding):
    """Pure-JAX NCHW reference matching PyTorch SepConv (eval-mode BN)."""
    (wdw1, wpw1, g1, beta1, m1, v1,
     wdw2, wpw2, g2, beta2, m2, v2) = params
    eps = 1e-5
    C_in = x.shape[1]
    dn = ('NCHW', 'OIHW', 'NCHW')
    pad = [(padding, padding), (padding, padding)]
    prec = lax.Precision.HIGHEST

    def bn(y, g, b, m, v):
        inv = g / jnp.sqrt(v + eps)
        return y * inv[None, :, None, None] + (b - m * inv)[None, :, None, None]

    y = jax.nn.relu(x)
    y = lax.conv_general_dilated(y, jnp.transpose(wdw1, (2, 0, 1))[:, None, :, :],
                                 (stride, stride), pad,
                                 feature_group_count=C_in, dimension_numbers=dn,
                                 precision=prec)
    y = lax.conv_general_dilated(y, wpw1.T[:, :, None, None], (1, 1), 'VALID',
                                 dimension_numbers=dn, precision=prec)
    y = bn(y, g1, beta1, m1, v1)
    y = jax.nn.relu(y)
    y = lax.conv_general_dilated(y, jnp.transpose(wdw2, (2, 0, 1))[:, None, :, :],
                                 (1, 1), pad,
                                 feature_group_count=C_in, dimension_numbers=dn,
                                 precision=prec)
    y = lax.conv_general_dilated(y, wpw2.T[:, :, None, None], (1, 1), 'VALID',
                                 dimension_numbers=dn, precision=prec)
    y = bn(y, g2, beta2, m2, v2)
    return y


def init_params(key, C_in, C_out, K):
    ks = jax.random.split(key, 8)
    wdw1 = 0.2 * jax.random.normal(ks[0], (K, K, C_in), jnp.float32)
    wpw1 = 0.2 * jax.random.normal(ks[1], (C_in, C_in), jnp.float32)
    g1 = 1.0 + 0.1 * jax.random.normal(ks[2], (C_in,), jnp.float32)
    beta1 = 0.1 * jax.random.normal(ks[3], (C_in,), jnp.float32)
    m1 = jnp.zeros((C_in,), jnp.float32)
    v1 = jnp.ones((C_in,), jnp.float32)
    wdw2 = 0.2 * jax.random.normal(ks[4], (K, K, C_in), jnp.float32)
    wpw2 = 0.2 * jax.random.normal(ks[5], (C_in, C_out), jnp.float32)
    g2 = 1.0 + 0.1 * jax.random.normal(ks[6], (C_out,), jnp.float32)
    beta2 = 0.1 * jax.random.normal(ks[7], (C_out,), jnp.float32)
    m2 = jnp.zeros((C_out,), jnp.float32)
    v2 = jnp.ones((C_out,), jnp.float32)
    return (wdw1, wpw1, g1, beta1, m1, v1, wdw2, wpw2, g2, beta2, m2, v2)


if __name__ == "__main__":
    # SepConv(C_in=4, C_out=8, kernel_size=3, stride=1, padding=1, shape=...)
    N, C_in, C_out, H, W = 2, 4, 8, 16, 16
    K, S, P = 3, 1, 1

    key = jax.random.PRNGKey(0)
    kx, kp = jax.random.split(key)
    x = jax.random.normal(kx, (N, C_in, H, W), jnp.float32)
    params = init_params(kp, C_in, C_out, K)

    run = functools.partial(sepconv_forward, kernel_size=K, stride=S, padding=P)

    ref = sepconv_reference(x, params, kernel_size=K, stride=S, padding=P)
    ref = jax.block_until_ready(ref)

    # Structural parity check at f32 (tight tolerance).
    out_f32 = jax.jit(functools.partial(run, use_bf16=False))(x, params)
    out_f32 = jax.block_until_ready(out_f32)
    assert out_f32.shape == ref.shape, (out_f32.shape, ref.shape)
    if not jnp.allclose(out_f32, ref, rtol=1e-4, atol=1e-4):
        raise AssertionError(
            f"f32 mismatch: max abs err {jnp.max(jnp.abs(out_f32 - ref))}")

    # Default fast path: bf16 MXU operands + f32 accumulation (looser tolerance).
    out = jax.jit(run)(x, params)
    out = jax.block_until_ready(out)
    assert out.shape == ref.shape, (out.shape, ref.shape)
    if not jnp.allclose(out, ref, rtol=3e-2, atol=3e-2):
        raise AssertionError(
            f"bf16 mismatch: max abs err {jnp.max(jnp.abs(out - ref))}")

    print("KERNEL_OK")
</pallas_src>

<mosaic_0001>
module attributes {stable_mosaic.version = 11 : i64} {
  func.func @kernel(%arg0: i32, %arg1: memref<1x20x64xf32, #tpu.memory_space<vmem>>, %arg2: memref<3x64x64xf32, #tpu.memory_space<vmem>>, %arg3: memref<1x64xf32, #tpu.memory_space<vmem>>, %arg4: memref<3x64x128xf32, #tpu.memory_space<vmem>>, %arg5: memref<1x128xf32, #tpu.memory_space<vmem>>, %arg6: memref<1x16x128xf32, #tpu.memory_space<vmem>>) attributes {dimension_semantics = [#tpu.dimension_semantics<parallel>], iteration_bounds = array<i64: 2>, scalar_prefetch = 0 : i64, scratch_operands = 0 : i64, tpu.core_type = #tpu.core_type<tc>, window_params = [{transform_indices = @transform_0, window_bounds = array<i64: 1, 20, 64>}, {pipeline_mode = #tpu.pipeline_mode<synchronous>, transform_indices = @transform_1, window_bounds = array<i64: 3, 64, 64>}, {pipeline_mode = #tpu.pipeline_mode<synchronous>, transform_indices = @transform_2, window_bounds = array<i64: 1, 64>}, {pipeline_mode = #tpu.pipeline_mode<synchronous>, transform_indices = @transform_3, window_bounds = array<i64: 3, 64, 128>}, {pipeline_mode = #tpu.pipeline_mode<synchronous>, transform_indices = @transform_4, window_bounds = array<i64: 1, 128>}, {transform_indices = @transform_5, window_bounds = array<i64: 1, 16, 128>}]} {
    %c0 = arith.constant 0 : index
    %c0_0 = arith.constant 0 : index
    %c0_1 = arith.constant 0 : index
    %0 = vector.load %arg2[%c0, %c0_0, %c0_1] : memref<3x64x64xf32, #tpu.memory_space<vmem>>, vector<3x64x64xf32>
    %c0_2 = arith.constant 0 : index
    %c0_3 = arith.constant 0 : index
    %c0_4 = arith.constant 0 : index
    %1 = vector.load %arg4[%c0_2, %c0_3, %c0_4] : memref<3x64x128xf32, #tpu.memory_space<vmem>>, vector<3x64x128xf32>
    %cst = arith.constant 0.000000e+00 : f32
    %2 = vector.broadcast %cst : f32 to vector<18x64xf32>
    %c0_5 = arith.constant 0 : index
    %c0_6 = arith.constant 0 : index
    %c0_7 = arith.constant 0 : index
    %3 = vector.load %arg1[%c0_5, %c0_6, %c0_7] : memref<1x20x64xf32, #tpu.memory_space<vmem>>, vector<1x20x64xf32>
    %cst_8 = arith.constant 0.000000e+00 : f32
    %4 = vector.broadcast %cst_8 : f32 to vector<1x20x64xf32>
    %5 = arith.maximumf %3, %4 : vector<1x20x64xf32>
    %6 = vector.extract_strided_slice %5 {offsets = [0, 0, 0], sizes = [1, 18, 64], strides = [1, 1, 1]} : vector<1x20x64xf32> to vector<1x18x64xf32>
    %7 = vector.shape_cast %6 : vector<1x18x64xf32> to vector<18x64xf32>
    %8 = vector.extract_strided_slice %0 {offsets = [0, 0, 0], sizes = [1, 64, 64], strides = [1, 1, 1]} : vector<3x64x64xf32> to vector<1x64x64xf32>
    %9 = vector.shape_cast %8 : vector<1x64x64xf32> to vector<64x64xf32>
    %cst_9 = arith.constant dense<0.000000e+00> : vector<18x64xf32>
    %10 = tpu.matmul %7, %9, %cst_9 {dimension_numbers = #tpu.dot_dimension_numbers<[1], [0], [0], [1], [0, 0, 1, 1], [], []>} : vector<18x64xf32>, vector<64x64xf32>, vector<18x64xf32> -> vector<18x64xf32>
    %11 = arith.addf %2, %10 : vector<18x64xf32>
    %12 = vector.extract_strided_slice %5 {offsets = [0, 1, 0], sizes = [1, 18, 64], strides = [1, 1, 1]} : vector<1x20x64xf32> to vector<1x18x64xf32>
    %13 = vector.shape_cast %12 : vector<1x18x64xf32> to vector<18x64xf32>
    %14 = vector.extract_strided_slice %0 {offsets = [1, 0, 0], sizes = [1, 64, 64], strides = [1, 1, 1]} : vector<3x64x64xf32> to vector<1x64x64xf32>
    %15 = vector.shape_cast %14 : vector<1x64x64xf32> to vector<64x64xf32>
    %cst_10 = arith.constant dense<0.000000e+00> : vector<18x64xf32>
    %16 = tpu.matmul %13, %15, %cst_10 {dimension_numbers = #tpu.dot_dimension_numbers<[1], [0], [0], [1], [0, 0, 1, 1], [], []>} : vector<18x64xf32>, vector<64x64xf32>, vector<18x64xf32> -> vector<18x64xf32>
    %17 = arith.addf %11, %16 : vector<18x64xf32>
    %18 = vector.extract_strided_slice %5 {offsets = [0, 2, 0], sizes = [1, 18, 64], strides = [1, 1, 1]} : vector<1x20x64xf32> to vector<1x18x64xf32>
    %19 = vector.shape_cast %18 : vector<1x18x64xf32> to vector<18x64xf32>
    %20 = vector.extract_strided_slice %0 {offsets = [2, 0, 0], sizes = [1, 64, 64], strides = [1, 1, 1]} : vector<3x64x64xf32> to vector<1x64x64xf32>
    %21 = vector.shape_cast %20 : vector<1x64x64xf32> to vector<64x64xf32>
    %cst_11 = arith.constant dense<0.000000e+00> : vector<18x64xf32>
    %22 = tpu.matmul %19, %21, %cst_11 {dimension_numbers = #tpu.dot_dimension_numbers<[1], [0], [0], [1], [0, 0, 1, 1], [], []>} : vector<18x64xf32>, vector<64x64xf32>, vector<18x64xf32> -> vector<18x64xf32>
    %23 = arith.addf %17, %22 : vector<18x64xf32>
    %c0_12 = arith.constant 0 : index
    %c0_13 = arith.constant 0 : index
    %24 = vector.load %arg3[%c0_12, %c0_13] : memref<1x64xf32, #tpu.memory_space<vmem>>, vector<1x64xf32>
    %25 = vector.broadcast %24 : vector<1x64xf32> to vector<18x64xf32>
    %26 = arith.addf %23, %25 : vector<18x64xf32>
    %cst_14 = arith.constant 0.000000e+00 : f32
    %27 = vector.broadcast %cst_14 : f32 to vector<18x64xf32>
    %28 = arith.maximumf %26, %27 : vector<18x64xf32>
    %29 = vector.shape_cast %28 : vector<18x64xf32> to vector<1x18x64xf32>
    %30 = tpu.iota {dimensions = array<i32: 1>} : vector<1x18x1xi32>
    %c1_i32 = arith.constant 1 : i32
    %31 = vector.broadcast %c1_i32 : i32 to vector<1x18x1xi32>
    %32 = arith.cmpi sge, %30, %31 : vector<1x18x1xi32>
    %c17_i32 = arith.constant 17 : i32
    %33 = vector.broadcast %c17_i32 : i32 to vector<1x18x1xi32>
    %34 = arith.cmpi slt, %30, %33 : vector<1x18x1xi32>
    %35 = arith.andi %32, %34 : vector<1x18x1xi1>
    %cst_15 = arith.constant 0.000000e+00 : f32
    %36 = vector.shape_cast %35 : vector<1x18x1xi1> to vector<1x18x1xi1>
    %37 = vector.broadcast %36 : vector<1x18x1xi1> to vector<1x18x64xi1>
    %38 = vector.broadcast %cst_15 : f32 to vector<1x18x64xf32>
    %39 = arith.select %37, %29, %38 : vector<1x18x64xi1>, vector<1x18x64xf32>
    %cst_16 = arith.constant 0.000000e+00 : f32
    %40 = vector.broadcast %cst_16 : f32 to vector<16x128xf32>
    %41 = vector.extract_strided_slice %39 {offsets = [0, 0, 0], sizes = [1, 16, 64], strides = [1, 1, 1]} : vector<1x18x64xf32> to vector<1x16x64xf32>
    %42 = vector.shape_cast %41 : vector<1x16x64xf32> to vector<16x64xf32>
    %43 = vector.extract_strided_slice %1 {offsets = [0, 0, 0], sizes = [1, 64, 128], strides = [1, 1, 1]} : vector<3x64x128xf32> to vector<1x64x128xf32>
    %44 = vector.shape_cast %43 : vector<1x64x128xf32> to vector<64x128xf32>
    %cst_17 = arith.constant dense<0.000000e+00> : vector<16x128xf32>
    %45 = tpu.matmul %42, %44, %cst_17 {dimension_numbers = #tpu.dot_dimension_numbers<[1], [0], [0], [1], [0, 0, 1, 1], [], []>} : vector<16x64xf32>, vector<64x128xf32>, vector<16x128xf32> -> vector<16x128xf32>
    %46 = arith.addf %40, %45 : vector<16x128xf32>
    %47 = vector.extract_strided_slice %39 {offsets = [0, 1, 0], sizes = [1, 16, 64], strides = [1, 1, 1]} : vector<1x18x64xf32> to vector<1x16x64xf32>
    %48 = vector.shape_cast %47 : vector<1x16x64xf32> to vector<16x64xf32>
    %49 = vector.extract_strided_slice %1 {offsets = [1, 0, 0], sizes = [1, 64, 128], strides = [1, 1, 1]} : vector<3x64x128xf32> to vector<1x64x128xf32>
    %50 = vector.shape_cast %49 : vector<1x64x128xf32> to vector<64x128xf32>
    %cst_18 = arith.constant dense<0.000000e+00> : vector<16x128xf32>
    %51 = tpu.matmul %48, %50, %cst_18 {dimension_numbers = #tpu.dot_dimension_numbers<[1], [0], [0], [1], [0, 0, 1, 1], [], []>} : vector<16x64xf32>, vector<64x128xf32>, vector<16x128xf32> -> vector<16x128xf32>
    %52 = arith.addf %46, %51 : vector<16x128xf32>
    %53 = vector.extract_strided_slice %39 {offsets = [0, 2, 0], sizes = [1, 16, 64], strides = [1, 1, 1]} : vector<1x18x64xf32> to vector<1x16x64xf32>
    %54 = vector.shape_cast %53 : vector<1x16x64xf32> to vector<16x64xf32>
    %55 = vector.extract_strided_slice %1 {offsets = [2, 0, 0], sizes = [1, 64, 128], strides = [1, 1, 1]} : vector<3x64x128xf32> to vector<1x64x128xf32>
    %56 = vector.shape_cast %55 : vector<1x64x128xf32> to vector<64x128xf32>
    %cst_19 = arith.constant dense<0.000000e+00> : vector<16x128xf32>
    %57 = tpu.matmul %54, %56, %cst_19 {dimension_numbers = #tpu.dot_dimension_numbers<[1], [0], [0], [1], [0, 0, 1, 1], [], []>} : vector<16x64xf32>, vector<64x128xf32>, vector<16x128xf32> -> vector<16x128xf32>
    %58 = arith.addf %52, %57 : vector<16x128xf32>
    %c0_20 = arith.constant 0 : index
    %c0_21 = arith.constant 0 : index
    %59 = vector.load %arg5[%c0_20, %c0_21] : memref<1x128xf32, #tpu.memory_space<vmem>>, vector<1x128xf32>
    %60 = vector.broadcast %59 : vector<1x128xf32> to vector<16x128xf32>
    %61 = arith.addf %58, %60 : vector<16x128xf32>
    %62 = vector.shape_cast %61 : vector<16x128xf32> to vector<1x16x128xf32>
    %c0_22 = arith.constant 0 : index
    %c0_23 = arith.constant 0 : index
    %c0_24 = arith.constant 0 : index
    %63 = vector.load %arg6[%c0_22, %c0_23, %c0_24] : memref<1x16x128xf32, #tpu.memory_space<vmem>>, vector<1x16x128xf32>
    tpu.vector_store %arg6[%c0_22, %c0_23, %c0_24], %62 {strides = array<i32>} : memref<1x16x128xf32, #tpu.memory_space<vmem>>, vector<1x16x128xf32>,
    return
  }
  func.func @transform_0(%arg0: i32) -> (i32, i32, i32) {
    %c0_i32 = arith.constant 0 : i32
    %c0_i32_0 = arith.constant 0 : i32
    %c0_i32_1 = arith.constant 0 : i32
    return %arg0, %c0_i32, %c0_i32_0 : i32, i32, i32
  }
  func.func @transform_1(%arg0: i32) -> (i32, i32, i32) {
    %c0_i32 = arith.constant 0 : i32
    %c0_i32_0 = arith.constant 0 : i32
    %c0_i32_1 = arith.constant 0 : i32
    %c0_i32_2 = arith.constant 0 : i32
    return %c0_i32, %c0_i32_0, %c0_i32_1 : i32, i32, i32
  }
  func.func @transform_2(%arg0: i32) -> (i32, i32) {
    %c0_i32 = arith.constant 0 : i32
    %c0_i32_0 = arith.constant 0 : i32
    %c0_i32_1 = arith.constant 0 : i32
    return %c0_i32, %c0_i32_0 : i32, i32
  }
  func.func @transform_3(%arg0: i32) -> (i32, i32, i32) {
    %c0_i32 = arith.constant 0 : i32
    %c0_i32_0 = arith.constant 0 : i32
    %c0_i32_1 = arith.constant 0 : i32
    %c0_i32_2 = arith.constant 0 : i32
    return %c0_i32, %c0_i32_0, %c0_i32_1 : i32, i32, i32
  }
  func.func @transform_4(%arg0: i32) -> (i32, i32) {
    %c0_i32 = arith.constant 0 : i32
    %c0_i32_0 = arith.constant 0 : i32
    %c0_i32_1 = arith.constant 0 : i32
    return %c0_i32, %c0_i32_0 : i32, i32
  }
  func.func @transform_5(%arg0: i32) -> (i32, i32, i32) {
    %c0_i32 = arith.constant 0 : i32
    %c0_i32_0 = arith.constant 0 : i32
    %c0_i32_1 = arith.constant 0 : i32
    return %arg0, %c0_i32, %c0_i32_0 : i32, i32, i32
  }
}

</mosaic_0001>

<bundles_post_ra>
// kernel: tile.13
= control target key start
LH: loop header
LB: loop body
LE: loop exit
PB: predicated region body
PF: predicated region fallthrough
CT: control target
= control target key end

     0   :  { %s28_s0 = inlined_call_operand.vmem [shape: f32[4], index: 0, kind: input, shape index: {}]   ;;  %s29_s1 = inlined_call_operand.vmem [shape: f32[16,4], index: 1, kind: output, shape index: {}]  }
   0x1   :  { %v4_v0 = vld [vmem:[%s28_s0] ss:$0 sm:$0xff] }
   0x2   :  { %5 = vst [vmem:[%s29_s1] sm:$0xff] %v4_v0  ;;  %8 = vst [vmem:[%s29_s1 + $0x8] sm:$0xff] %v4_v0 }

// kernel: tile.14
= control target key start
LH: loop header
LB: loop body
LE: loop exit
PB: predicated region body
PF: predicated region fallthrough
CT: control target
= control target key end

     0   :  { %s131_s10 = smov 60   ;;  %s132_s11 = smov 52   ;;  %vm3_vm0 = vcmask 31744   ;;  %vm9_vm1 = vcmask 523744   ;;  %vm15_vm2 = vcmask 490944   ;;  %vm21_vm3 = vcmask 458144   ;;  %s207_s0 = inlined_call_operand.vmem [shape: f32[16,4], index: 0, kind: input, shape index: {}]   ;;  %s208_s1 = inlined_call_operand.vmem [shape: f32[1,64], index: 1, kind: output, shape index: {}]  }
   0x1   :  { %v101_v0 = vld [vmem:[%s207_s0 + $0xf] sm:$0x1]   ;;  %v103_v1 = vld [vmem:[%s207_s0 + $0xd] sm:$0x1]   ;;  %v102_v2 = vld [vmem:[%s207_s0 + $0xe] sm:$0x1]  }
   0x2   :  { %7 = vrot.lane.b32.xlu0 %v101_v0, %s131_s10  ;;  %19 = vrot.lane.b32.xlu1 %v103_v1, %s132_s11  ;;  %v104_v3 = vld [vmem:[%s207_s0 + $0xc] sm:$0x1]   ;;  %s133_s16 = smov 56   ;;  %s134_s17 = smov 48   ;;  %v105_v4 = vld [vmem:[%s207_s0 + $0xb] sm:$0x1]  }
   0x3   :  { %v106_v5 = vld [vmem:[%s207_s0 + $0xa] sm:$0x1]   ;;  %v2_v6 = vld [vmem:[%s207_s0] sm:$0x1]   ;;  %s135_s24 = smov 44   ;;  %s136_s25 = smov 40  }
   0x4   :  { %4 = vst.msk [vmem:[#allocation0] sm:$0x1] %vm3_vm0, %v2_v6   ;;  %v107_v7 = vld [vmem:[%s207_s0 + $0x9] sm:$0x1]   ;;  %v108_v8 = vld [vmem:[%s207_s0 + $0x8] sm:$0x1]  }
   0x5   :  { %s137_s30 = smov 36   ;;  %s138_s2 = smov 32   ;;  %v109_v9 = vld [vmem:[%s207_s0 + $0x7] sm:$0x1]   ;;  %v110_v10 = vld [vmem:[%s207_s0 + $0x6] sm:$0x1]  }
   0x6   :  { %13 = vrot.lane.b32.xlu0 %v102_v2, %s133_s16  ;;  %25 = vrot.lane.b32.xlu1 %v104_v3, %s134_s17  ;;  %s139_s7 = smov 28   ;;  %s140_s8 = smov 24   ;;  %v111_v11 = vld [vmem:[%s207_s0 + $0x5] sm:$0x1]   ;;  %v112_v12 = vld [vmem:[%s207_s0 + $0x4] sm:$0x1]  }
   0x7   :  { %s141_s13 = smov 20   ;;  %s142_s14 = smov 16   ;;  %v113_v13 = vld [vmem:[%s207_s0 + $0x3] sm:$0x1]   ;;  %v114_v14 = vld [vmem:[%s207_s0 + $0x2] sm:$0x1]  }
   0x8   :  { %s143_s19 = smov 12   ;;  %s144_s20 = smov 8   ;;  %v115_v15 = vld [vmem:[%s207_s0 + $0x1] sm:$0x1]   ;;  %vm27_vm4 = vcmask 425344   ;;  %vm33_vm5 = vcmask 392544  }
   0x9   :  { %s145_s0 = smov 4   ;;  %vm39_vm6 = vcmask 359744   ;;  %vm45_vm7 = vcmask 326944   ;;  %vm51_vm8 = vcmask 294144   ;;  %vm57_vm9 = vcmask 261344  }
   0xa   :  { %31 = vrot.lane.b32.xlu0 %v105_v4, %s135_s24  ;;  %37 = vrot.lane.b32.xlu1 %v106_v5, %s136_s25  ;;  %vm63_vm10 = vcmask 228544   ;;  %vm69_vm11 = vcmask 195744   ;;  %vm75_vm12 = vcmask 162944   ;;  %vm81_vm13 = vcmask 130144  }
   0xb   :  { %vm87_vm14 = vcmask 97344   ;;  %vm93_vm15 = vcmask 64544  }
   0xe   :  { %43 = vrot.lane.b32.xlu0 %v107_v7, %s137_s30  ;;  %49 = vrot.lane.b32.xlu1 %v108_v8, %s138_s2 }
  0x12   :  { %55 = vrot.lane.b32.xlu0 %v109_v9, %s139_s7  ;;  %61 = vrot.lane.b32.xlu1 %v110_v10, %s140_s8 }
  0x16   :  { %67 = vrot.lane.b32.xlu0 %v111_v11, %s141_s13  ;;  %73 = vrot.lane.b32.xlu1 %v112_v12, %s142_s14 }
  0x1a   :  { %79 = vrot.lane.b32.xlu0 %v113_v13, %s143_s19  ;;  %85 = vrot.lane.b32.xlu1 %v114_v14, %s144_s20 }
  0x1e   :  { %91 = vrot.lane.b32.xlu0 %v115_v15, %s145_s0 }
  0x74   :  { %v8_v16 = vpop.permute.xlu0 %7   ;;  %v20_v17 = vpop.permute.xlu1 %19  }
  0x75   :  { %10 = vst.msk [vmem:[#allocation0] sm:$0x1] %vm9_vm1, %v8_v16  }
  0x78   :  { %v14_v18 = vpop.permute.xlu0 %13   ;;  %v26_v19 = vpop.permute.xlu1 %25  }
  0x79   :  { %16 = vst.msk [vmem:[#allocation0] sm:$0x1] %vm15_vm2, %v14_v18  }
  0x7a   :  { %22 = vst.msk [vmem:[#allocation0] sm:$0x1] %vm21_vm3, %v20_v17  }
  0x7b   :  { %28 = vst.msk [vmem:[#allocation0] sm:$0x1] %vm27_vm4, %v26_v19  }
  0x7c   :  { %v32_v20 = vpop.permute.xlu0 %31   ;;  %v38_v21 = vpop.permute.xlu1 %37  }
  0x7d   :  { %34 = vst.msk [vmem:[#allocation0] sm:$0x1] %vm33_vm5, %v32_v20  }
  0x7e   :  { %40 = vst.msk [vmem:[#allocation0] sm:$0x1] %vm39_vm6, %v38_v21  }
  0x80   :  { %v44_v22 = vpop.permute.xlu0 %43   ;;  %v50_v23 = vpop.permute.xlu1 %49  }
  0x81   :  { %46 = vst.msk [vmem:[#allocation0] sm:$0x1] %vm45_vm7, %v44_v22  }
  0x82   :  { %52 = vst.msk [vmem:[#allocation0] sm:$0x1] %vm51_vm8, %v50_v23  }
  0x84   :  { %v56_v24 = vpop.permute.xlu0 %55   ;;  %v62_v25 = vpop.permute.xlu1 %61  }
  0x85   :  { %58 = vst.msk [vmem:[#allocation0] sm:$0x1] %vm57_vm9, %v56_v24  }
  0x86   :  { %64 = vst.msk [vmem:[#allocation0] sm:$0x1] %vm63_vm10, %v62_v25  }
  0x88   :  { %v68_v26 = vpop.permute.xlu0 %67   ;;  %v74_v27 = vpop.permute.xlu1 %73  }
  0x89   :  { %70 = vst.msk [vmem:[#allocation0] sm:$0x1] %vm69_vm11, %v68_v26  }
  0x8a   :  { %76 = vst.msk [vmem:[#allocation0] sm:$0x1] %vm75_vm12, %v74_v27  }
  0x8c   :  { %v80_v28 = vpop.permute.xlu0 %79   ;;  %v86_v29 = vpop.permute.xlu1 %85  }
  0x8d   :  { %82 = vst.msk [vmem:[#allocation0] sm:$0x1] %vm81_vm13, %v80_v28  }
  0x8e   :  { %88 = vst.msk [vmem:[#allocation0] sm:$0x1] %vm87_vm14, %v86_v29  }
  0x90   :  { %v92_v30 = vpop.permute.xlu0 %91  }
  0x91   :  { %94 = vst.msk [vmem:[#allocation0] sm:$0x1] %vm93_vm15, %v92_v30  }
  0x98   :  { %v98_v31 = vld [vmem:[#allocation0] sm:$0x1] }
  0x99   :  { %100 = vst [vmem:[%s208_s1] sm:$0x1] %v98_v31 }

// kernel: tile.18
= control target key start
LH: loop header
LB: loop body
LE: loop exit
PB: predicated region body
PF: predicated region fallthrough
CT: control target
= control target key end

     0   :  { %s28_s0 = inlined_call_operand.vmem [shape: f32[8], index: 0, kind: input, shape index: {}]   ;;  %s29_s1 = inlined_call_operand.vmem [shape: f32[16,8], index: 1, kind: output, shape index: {}]  }
   0x1   :  { %v4_v0 = vld [vmem:[%s28_s0] ss:$0 sm:$0xff] }
   0x2   :  { %5 = vst [vmem:[%s29_s1] sm:$0xff] %v4_v0  ;;  %8 = vst [vmem:[%s29_s1 + $0x8] sm:$0xff] %v4_v0 }

// kernel: tile.19
= control target key start
LH: loop header
LB: loop body
LE: loop exit
PB: predicated region body
PF: predicated region fallthrough
CT: control target
= control target key end

     0   :  { %s131_s10 = smov 120   ;;  %s132_s11 = smov 104   ;;  %vm3_vm0 = vcmask 64512   ;;  %vm9_vm1 = vcmask 1048512   ;;  %vm15_vm2 = vcmask 982912   ;;  %vm21_vm3 = vcmask 917312   ;;  %s207_s0 = inlined_call_operand.vmem [shape: f32[16,8], index: 0, kind: input, shape index: {}]   ;;  %s208_s1 = inlined_call_operand.vmem [shape: f32[1,128], index: 1, kind: output, shape index: {}]  }
   0x1   :  { %v101_v0 = vld [vmem:[%s207_s0 + $0xf] sm:$0x1]   ;;  %v103_v1 = vld [vmem:[%s207_s0 + $0xd] sm:$0x1]   ;;  %v102_v2 = vld [vmem:[%s207_s0 + $0xe] sm:$0x1]  }
   0x2   :  { %7 = vrot.lane.b32.xlu0 %v101_v0, %s131_s10  ;;  %19 = vrot.lane.b32.xlu1 %v103_v1, %s132_s11  ;;  %v104_v3 = vld [vmem:[%s207_s0 + $0xc] sm:$0x1]   ;;  %s133_s16 = smov 112   ;;  %s134_s17 = smov 96   ;;  %v105_v4 = vld [vmem:[%s207_s0 + $0xb] sm:$0x1]  }
   0x3   :  { %v106_v5 = vld [vmem:[%s207_s0 + $0xa] sm:$0x1]   ;;  %v2_v6 = vld [vmem:[%s207_s0] sm:$0x1]   ;;  %s135_s24 = smov 88   ;;  %s136_s25 = smov 80  }
   0x4   :  { %4 = vst.msk [vmem:[#allocation0] sm:$0x1] %vm3_vm0, %v2_v6   ;;  %v107_v7 = vld [vmem:[%s207_s0 + $0x9] sm:$0x1]   ;;  %v108_v8 = vld [vmem:[%s207_s0 + $0x8] sm:$0x1]  }
   0x5   :  { %s137_s30 = smov 72   ;;  %s138_s2 = smov 64   ;;  %v109_v9 = vld [vmem:[%s207_s0 + $0x7] sm:$0x1]   ;;  %v110_v10 = vld [vmem:[%s207_s0 + $0x6] sm:$0x1]  }
   0x6   :  { %13 = vrot.lane.b32.xlu0 %v102_v2, %s133_s16  ;;  %25 = vrot.lane.b32.xlu1 %v104_v3, %s134_s17  ;;  %s139_s7 = smov 56   ;;  %s140_s8 = smov 48   ;;  %v111_v11 = vld [vmem:[%s207_s0 + $0x5] sm:$0x1]   ;;  %v112_v12 = vld [vmem:[%s207_s0 + $0x4] sm:$0x1]  }
   0x7   :  { %s141_s13 = smov 40   ;;  %s142_s14 = smov 32   ;;  %v113_v13 = vld [vmem:[%s207_s0 + $0x3] sm:$0x1]   ;;  %v114_v14 = vld [vmem:[%s207_s0 + $0x2] sm:$0x1]  }
   0x8   :  { %s143_s19 = smov 24   ;;  %s144_s20 = smov 16   ;;  %v115_v15 = vld [vmem:[%s207_s0 + $0x1] sm:$0x1]   ;;  %vm27_vm4 = vcmask 851712   ;;  %vm33_vm5 = vcmask 786112  }
   0x9   :  { %s145_s0 = smov 8   ;;  %vm39_vm6 = vcmask 720512   ;;  %vm45_vm7 = vcmask 654912   ;;  %vm51_vm8 = vcmask 589312   ;;  %vm57_vm9 = vcmask 523712  }
   0xa   :  { %31 = vrot.lane.b32.xlu0 %v105_v4, %s135_s24  ;;  %37 = vrot.lane.b32.xlu1 %v106_v5, %s136_s25  ;;  %vm63_vm10 = vcmask 458112   ;;  %vm69_vm11 = vcmask 392512   ;;  %vm75_vm12 = vcmask 326912   ;;  %vm81_vm13 = vcmask 261312  }
   0xb   :  { %vm87_vm14 = vcmask 195712   ;;  %vm93_vm15 = vcmask 130112  }
   0xe   :  { %43 = vrot.lane.b32.xlu0 %v107_v7, %s137_s30  ;;  %49 = vrot.lane.b32.xlu1 %v108_v8, %s138_s2 }
  0x12   :  { %55 = vrot.lane.b32.xlu0 %v109_v9, %s139_s7  ;;  %61 = vrot.lane.b32.xlu1 %v110_v10, %s140_s8 }
  0x16   :  { %67 = vrot.lane.b32.xlu0 %v111_v11, %s141_s13  ;;  %73 = vrot.lane.b32.xlu1 %v112_v12, %s142_s14 }
  0x1a   :  { %79 = vrot.lane.b32.xlu0 %v113_v13, %s143_s19  ;;  %85 = vrot.lane.b32.xlu1 %v114_v14, %s144_s20 }
  0x1e   :  { %91 = vrot.lane.b32.xlu0 %v115_v15, %s145_s0 }
  0x74   :  { %v8_v16 = vpop.permute.xlu0 %7   ;;  %v20_v17 = vpop.permute.xlu1 %19  }
  0x75   :  { %10 = vst.msk [vmem:[#allocation0] sm:$0x1] %vm9_vm1, %v8_v16  }
  0x78   :  { %v14_v18 = vpop.permute.xlu0 %13   ;;  %v26_v19 = vpop.permute.xlu1 %25  }
  0x79   :  { %16 = vst.msk [vmem:[#allocation0] sm:$0x1] %vm15_vm2, %v14_v18  }
  0x7a   :  { %22 = vst.msk [vmem:[#allocation0] sm:$0x1] %vm21_vm3, %v20_v17  }
  0x7b   :  { %28 = vst.msk [vmem:[#allocation0] sm:$0x1] %vm27_vm4, %v26_v19  }
  0x7c   :  { %v32_v20 = vpop.permute.xlu0 %31   ;;  %v38_v21 = vpop.permute.xlu1 %37  }
  0x7d   :  { %34 = vst.msk [vmem:[#allocation0] sm:$0x1] %vm33_vm5, %v32_v20  }
  0x7e   :  { %40 = vst.msk [vmem:[#allocation0] sm:$0x1] %vm39_vm6, %v38_v21  }
  0x80   :  { %v44_v22 = vpop.permute.xlu0 %43   ;;  %v50_v23 = vpop.permute.xlu1 %49  }
  0x81   :  { %46 = vst.msk [vmem:[#allocation0] sm:$0x1] %vm45_vm7, %v44_v22  }
  0x82   :  { %52 = vst.msk [vmem:[#allocation0] sm:$0x1] %vm51_vm8, %v50_v23  }
  0x84   :  { %v56_v24 = vpop.permute.xlu0 %55   ;;  %v62_v25 = vpop.permute.xlu1 %61  }
  0x85   :  { %58 = vst.msk [vmem:[#allocation0] sm:$0x1] %vm57_vm9, %v56_v24  }
  0x86   :  { %64 = vst.msk [vmem:[#allocation0] sm:$0x1] %vm63_vm10, %v62_v25  }
  0x88   :  { %v68_v26 = vpop.permute.xlu0 %67   ;;  %v74_v27 = vpop.permute.xlu1 %73  }
  0x89   :  { %70 = vst.msk [vmem:[#allocation0] sm:$0x1] %vm69_vm11, %v68_v26  }
  0x8a   :  { %76 = vst.msk [vmem:[#allocation0] sm:$0x1] %vm75_vm12, %v74_v27  }
  0x8c   :  { %v80_v28 = vpop.permute.xlu0 %79   ;;  %v86_v29 = vpop.permute.xlu1 %85  }
  0x8d   :  { %82 = vst.msk [vmem:[#allocation0] sm:$0x1] %vm81_vm13, %v80_v28  }
  0x8e   :  { %88 = vst.msk [vmem:[#allocation0] sm:$0x1] %vm87_vm14, %v86_v29  }
  0x90   :  { %v92_v30 = vpop.permute.xlu0 %91  }
  0x91   :  { %94 = vst.msk [vmem:[#allocation0] sm:$0x1] %vm93_vm15, %v92_v30  }
  0x98   :  { %v98_v31 = vld [vmem:[#allocation0] sm:$0x1] }
  0x99   :  { %100 = vst [vmem:[%s208_s1] sm:$0x1] %v98_v31 }

// kernel: sepconv_forward.1
= control target key start
LH: loop header
LB: loop body
LE: loop exit
PB: predicated region body
PF: predicated region fallthrough
CT: control target
= control target key end

     0   :  { %s1273_s18 = smov 0   ;;  %s1497_s0 = inlined_call_operand.vmem [shape: f32[2,20,64], index: 0, kind: input, shape index: {}]   ;;  %s1498_s1 = inlined_call_operand.vmem [shape: f32[3,64,64], index: 1, kind: input, shape index: {}]   ;;  %s1499_s2 = inlined_call_operand.vmem [shape: f32[1,64], index: 2, kind: input, shape index: {}]   ;;  %s1500_s3 = inlined_call_operand.vmem [shape: f32[3,64,128], index: 3, kind: input, shape index: {}]   ;;  %s1501_s4 = inlined_call_operand.vmem [shape: f32[1,128], index: 4, kind: input, shape index: {}]   ;;  %s1502_s5 = inlined_call_operand.vmem [shape: f32[2,16,128], index: 5, kind: output, shape index: {}]  }
   0x1 LB: > { %s909_s19 = sadd.s32 4294967295, %s1238_s18   ;;  %p913_p0 = scmp.ge.s32.totalorder %s1238_s18, 1  ;;  %s1238_s18 = sphi %s1273_s18, %s15_s18  }
   0x2   : > { %p187_p1 = scmp.lt.s32.totalorder %s1238_s18, 3 }
   0x4   : > { %p188_p2 = pnand %p913_p0, %p187_p1 }
   0x5   : > { %v233_v0 = vld [vmem:[%s1498_s1 + $0x40] sm:$0xff] (!%p188_p2)  ;;  %v234_v1 = vld [vmem:[%s1498_s1 + $0x48] sm:$0xff] (!%p188_p2)  ;;  %v1240_v3 = vmov (!%p188_p2), 0.0|0.0   ;;  %v235_v6 = vld [vmem:[%s1498_s1 + $0x50] sm:$0xff] (!%p188_p2)  ;;  %p215_p3 = scmp.lt.s32.totalorder (!%p188_p2), %s909_s19, 1  ;;  %vm1241_vm0 = vmmov (!%p188_p2), 0  }
   0x6   : > { %191 = sbr.rel (%p188_p2) target bundleno = 495 (0x1ef), region = 40  ;;  %v225_v2 = vld [vmem:[%s1498_s1] sm:$0xff] (!%p188_p2)  ;;  %1132 = vmatprep.subr.bf16.mxu0 (!%p188_p2), %v1240_v3  ;;  %v1133_v4 = vpack.c.bf16 (!%p188_p2), %v234_v1, %v233_v0  ;;  %1144 = vmatprep.subr.bf16.mxu1 (!%p188_p2), %v1240_v3  ;;  %v226_v5 = vld [vmem:[%s1498_s1 + $0x8] sm:$0xff] (!%p188_p2)  ;;  %v236_v7 = vld [vmem:[%s1498_s1 + $0x58] sm:$0xff] (!%p188_p2)  ;;  %v1242_v11 = vmov (!%p188_p2), 0.0   ;;  %vm282_vm1 = vcmask (!%p188_p2), 1046528  }
   0x7   : > { %v1145_v8 = vpack.c.bf16 (!%p188_p2), %v226_v5, %v225_v2  ;;  %v227_v9 = vld [vmem:[%s1498_s1 + $0x10] sm:$0xff] (!%p188_p2)  ;;  %v228_v10 = vld [vmem:[%s1498_s1 + $0x18] sm:$0xff] (!%p188_p2)  ;;  %1016 = vmatprep.mubr.msk.f32.mxu0 (!%p188_p2), %vm1241_vm0, %v1242_v11  ;;  %1041 = vmatprep.mubr.msk.f32.mxu1 (!%p188_p2), %vm1241_vm0, %v1242_v11  ;;  %v1136_v12 = vpack.c.bf16 (!%p188_p2), %v236_v7, %v235_v6  ;;  %v237_v14 = vld [vmem:[%s1498_s1 + $0x60] sm:$0xff] (!%p188_p2)  ;;  %vm288_vm2 = vcmask (!%p188_p2), 523264   ;;  %vm461_vm3 = vcmask (!%p188_p2), 1045504  }
   0x8   : > { %1134 = vmatpush3.bf16.msra.mxu0 (!%p188_p2), %v1133_v4  ;;  %v1148_v13 = vpack.c.bf16 (!%p188_p2), %v228_v10, %v227_v9  ;;  %v238_v15 = vld [vmem:[%s1498_s1 + $0x68] sm:$0xff] (!%p188_p2)  ;;  %v229_v16 = vld [vmem:[%s1498_s1 + $0x20] sm:$0xff] (!%p188_p2)  ;;  %v239_v19 = vld [vmem:[%s1498_s1 + $0x70] sm:$0xff] (!%p188_p2) }
   0x9   : > { %1146 = vmatpush3.bf16.msra.mxu1 (!%p188_p2), %v1145_v8  ;;  %1135 = vmatprep.subr.bf16.mxu0 (!%p188_p2), %v1240_v3  ;;  %v230_v17 = vld [vmem:[%s1498_s1 + $0x28] sm:$0xff] (!%p188_p2)  ;;  %v1139_v18 = vpack.c.bf16 (!%p188_p2), %v238_v15, %v237_v14  ;;  %v240_v20 = vld [vmem:[%s1498_s1 + $0x78] sm:$0xff] (!%p188_p2)  ;;  %v231_v25 = vld [vmem:[%s1498_s1 + $0x30] sm:$0xff] (!%p188_p2) }
   0xa   : > { %1147 = vmatprep.subr.bf16.mxu1 (!%p188_p2), %v1240_v3  ;;  %v1151_v21 = vpack.c.bf16 (!%p188_p2), %v230_v17, %v229_v16  ;;  %v232_v26 = vld [vmem:[%s1498_s1 + $0x38] sm:$0xff] (!%p188_p2)  ;;  %v1142_v29 = vpack.c.bf16 (!%p188_p2), %v240_v20, %v239_v19  ;;  %v241_v34 = vld [vmem:[%s1498_s1 + $0x80] sm:$0xff] (!%p188_p2)  ;;  %v242_v35 = vld [vmem:[%s1498_s1 + $0x88] sm:$0xff] (!%p188_p2) }
   0xb   : > { %v1154_v33 = vpack.c.bf16 (!%p188_p2), %v232_v26, %v231_v25  ;;  %v1157_v37 = vpack.c.bf16 (!%p188_p2), %v242_v35, %v241_v34  ;;  %v243_v39 = vld [vmem:[%s1498_s1 + $0x90] sm:$0xff] (!%p188_p2)  ;;  %v244_v40 = vld [vmem:[%s1498_s1 + $0x98] sm:$0xff] (!%p188_p2)  ;;  %v245_v43 = vld [vmem:[%s1498_s1 + $0xa0] sm:$0xff] (!%p188_p2) }
   0xc   : > { %1137 = vmatpush3.bf16.msra.mxu0 (!%p188_p2), %v1136_v12  ;;  %v1160_v41 = vpack.c.bf16 (!%p188_p2), %v244_v40, %v243_v39  ;;  %v246_v44 = vld [vmem:[%s1498_s1 + $0xa8] sm:$0xff] (!%p188_p2)  ;;  %v247_v46 = vld [vmem:[%s1498_s1 + $0xb0] sm:$0xff] (!%p188_p2)  ;;  %v248_v47 = vld [vmem:[%s1498_s1 + $0xb8] sm:$0xff] (!%p188_p2) }
   0xd   : > { %s1504_s19 = smov (!%p215_p3, %s909_s19), 1  ;;  %1149 = vmatpush3.bf16.msra.mxu1 %v1148_v13  ;;  %1138 = vmatprep.subr.bf16.mxu0 %v1240_v3  ;;  %v1163_v45 = vpack.c.bf16 %v246_v44, %v245_v43  ;;  %v1166_v48 = vpack.c.bf16 %v248_v47, %v247_v46  ;;  %v249_v54 = vld [vmem:[%s1500_s3] sm:$0xff]  ;;  %v250_v55 = vld [vmem:[%s1500_s3 + $0x8] sm:$0xff]  ;;  %v251_v57 = vld [vmem:[%s1500_s3 + $0x10] sm:$0xff] }
   0xe   : > { %s1220_s21 = smul.u32 24, %s1504_s19  ;;  %1150 = vmatprep.subr.bf16.mxu1 %v1240_v3  ;;  %v1184_v56 = vpack.c.bf16 %v250_v55, %v249_v54  ;;  %v252_v58 = vld [vmem:[%s1500_s3 + $0x18] sm:$0xff]  ;;  %v253_v60 = vld [vmem:[%s1500_s3 + $0x20] sm:$0xff]  ;;  %v254_v61 = vld [vmem:[%s1500_s3 + $0x28] sm:$0xff]  ;;  %s936_s30 = sshll.u32 %s1504_s19, 4 }
   0xf   : > { %v1188_v59 = vpack.c.bf16 %v252_v58, %v251_v57  ;;  %v1192_v62 = vpack.c.bf16 %v254_v61, %v253_v60  ;;  %v257_v63 = vld [vmem:[%s1500_s3 + $0x40] sm:$0xff]  ;;  %v258_v0 = vld [vmem:[%s1500_s3 + $0x48] sm:$0xff]  ;;  %v255_v2 = vld [vmem:[%s1500_s3 + $0x30] sm:$0xff]  ;;  %s224_s10 = scalar_lea.vmem %s1502_s5, %s936_s30 }
  0x10   : > { %s219_s28 = scalar_lea.vmem %s1497_s0, %s1220_s21  ;;  %1140 = vmatpush3.bf16.msra.mxu0 %v1139_v18  ;;  %v1168_v1 = vpack.c.bf16 %v258_v0, %v257_v63  ;;  %v259_v5 = vld [vmem:[%s1500_s3 + $0x50] sm:$0xff]  ;;  %v260_v6 = vld [vmem:[%s1500_s3 + $0x58] sm:$0xff]  ;;  %v265_v8 = vld [vmem:[%s1500_s3 + $0x80] sm:$0xff] }
  0x11   : > { %v273_v22 = vld [vmem:[%s219_s28] sm:$0xff]  ;;  %v274_v23 = vld [vmem:[%s219_s28 + $0x8] sm:$0xff]  ;;  %v275_v24 = vld [vmem:[%s219_s28 + $0x10] sm:$0xf]  ;;  %1152 = vmatpush3.bf16.msra.mxu1 %v1151_v21  ;;  %1141 = vmatprep.subr.bf16.mxu0 %v1240_v3  ;;  %v1172_v7 = vpack.c.bf16 %v260_v6, %v259_v5 }
  0x12   : > { %v276_v27 = vmax.f32 %v273_v22, 0.0  ;;  %v277_v28 = vmax.f32 %v274_v23, 0.0  ;;  %v278_v32 = vmax.f32 %v275_v24, 0.0  ;;  %1153 = vmatprep.subr.bf16.mxu1 %v1240_v3  ;;  %v266_v9 = vld [vmem:[%s1500_s3 + $0x88] sm:$0xff]  ;;  %v263_v14 = vld [vmem:[%s1500_s3 + $0x70] sm:$0xff]  ;;  %v264_v15 = vld [vmem:[%s1500_s3 + $0x78] sm:$0xff] }
  0x13   : > { %v1200_v10 = vpack.c.bf16 %v266_v9, %v265_v8  ;;  %v262_v12 = vld [vmem:[%s1500_s3 + $0x68] sm:$0xff]  ;;  %v1180_v16 = vpack.c.bf16 %v264_v15, %v263_v14  ;;  %v926_v34 = vld [vmem:[%s1499_s2] ss:$0 sm:$0xff]  ;;  %v267_v43 = vld [vmem:[%s1500_s3 + $0x90] sm:$0xff] }
  0x14   : > { %v283_v30 = vrot.slane %v276_v27, 1  ;;  %v284_v31 = vrot.slane %v277_v28, 1  ;;  %1143 = vmatpush3.bf16.msra.mxu0 %v1142_v29  ;;  %v286_v38 = vrot.slane %v278_v32, 1  ;;  %v462_v49 = vrot.slane %v276_v27, 2  ;;  %v268_v44 = vld [vmem:[%s1500_s3 + $0x98] sm:$0xff]  ;;  %v269_v54 = vld [vmem:[%s1500_s3 + $0xa0] sm:$0xff] }
  0x15   : > { %1155 = vmatpush3.bf16.msra.mxu1 %v1154_v33  ;;  %1156 = vmatprep.subr.bf16.mxu0 %v1240_v3  ;;  %v463_v50 = vrot.slane %v277_v28, 2  ;;  %v465_v52 = vrot.slane %v278_v32, 2  ;;  %v270_v55 = vld [vmem:[%s1500_s3 + $0xa8] sm:$0xff]  ;;  %v271_v0 = vld [vmem:[%s1500_s3 + $0xb0] sm:$0xff] }
  0x16   : > { %v285_v36 = vsel %vm282_vm1, %v283_v30, %v284_v31  ;;  %v287_v42 = vsel %vm282_vm1, %v284_v31, %v286_v38  ;;  %1185 = vmatprep.subr.bf16.mxu1 %v1184_v56  ;;  %v1208_v63 = vpack.c.bf16 %v270_v55, %v269_v54 }
  0x17   : > { %1017 = vmatmul.mubr.msk.f32.vlgmr.msra.gmra.mrb[0].mxu0 %vm288_vm2, %v285_v36  ;;  %v464_v51 = vsel %vm461_vm3, %v462_v49, %v463_v50  ;;  %v466_v53 = vsel %vm461_vm3, %v463_v50, %v465_v52 }
  0x18   : > { %1042 = vmatmul.mubr.msk.f32.vlgmr.msra.gmra.mrb[0].mxu1 %vm288_vm2, %v276_v27  ;;  %1158 = vmatpush3.bf16.msra.mxu0 %v1157_v37 }
  0x19   : > { %1159 = vmatprep.subr.bf16.mxu0 %v1240_v3  ;;  %1019 = vmatprep.mubr.msk.f32.mxu0 %vm1241_vm0, %v1242_v11 }
  0x1a   : > { %1044 = vmatprep.mubr.msk.f32.mxu1 %vm1241_vm0, %v1242_v11  ;;  %1187 = vmatpush3.bf16.msra.mxu1 %v1184_v56 }
  0x1b   : > { %1020 = vmatmul.mubr.msk.f32.gmra.mrb[2].mxu0 %vm288_vm2, %v287_v42  ;;  %1189 = vmatprep.subr.bf16.mxu1 %v1188_v59 }
  0x1c   : > { %1161 = vmatpush3.bf16.msra.mxu0 %v1160_v41  ;;  %1045 = vmatmul.mubr.msk.f32.gmra.mrb[2].mxu1 %vm288_vm2, %v277_v28 }
  0x1d   : > { %1162 = vmatprep.subr.bf16.mxu0 %v1240_v3  ;;  %1022 = vmatprep.mubr.msk.f32.mxu0 %vm1241_vm0, %v1242_v11 }
  0x1e   : > { %1047 = vmatprep.mubr.msk.f32.mxu1 %vm1241_vm0, %v1242_v11  ;;  %1191 = vmatpush3.bf16.msra.mxu1 %v1188_v59 }
  0x1f   : > { %1023 = vmatmul.mubr.msk.f32.gmra.mrb[4].mxu0 %vm288_vm2, %v286_v38  ;;  %1193 = vmatprep.subr.bf16.mxu1 %v1192_v62 }
  0x20   : > { %1164 = vmatpush3.bf16.msra.mxu0 %v1163_v45  ;;  %1048 = vmatmul.mubr.msk.f32.gmra.mrb[4].mxu1 %vm288_vm2, %v278_v32  ;;  %v569_v32 = vlaneseq }
  0x21   : > { %1165 = vmatprep.subr.bf16.mxu0 %v1240_v3  ;;  %1066 = vmatprep.mubr.msk.f32.mxu0 %vm1241_vm0, %v1242_v11  ;;  %v256_v3 = vld [vmem:[%s1500_s3 + $0x38] sm:$0xff] }
  0x22   : > { %1195 = vmatpush3.bf16.msra.mxu1 %v1192_v62  ;;  %v1196_v4 = vpack.c.bf16 %v256_v3, %v255_v2  ;;  %v570_v35 = vshrl.u32 %v569_v32, 7 }
  0x24   : > { %1167 = vmatpush3.bf16.msra.mxu0 %v1166_v48  ;;  %1197 = vmatprep.subr.bf16.mxu1 %v1196_v4  ;;  %vm573_vm4 = vcmp.ge.s32.totalorder %v570_v35, 1  ;;  %v572_v48 = vadd.s32 16, %v570_v35 }
  0x25   : > { %1169 = vmatprep.subr.bf16.mxu0 %v1168_v1 }
  0x26   : > { %1199 = vmatpush3.bf16.msra.mxu1 %v1196_v4  ;;  %vm578_vm5 = vcmp.lt.s32.totalorder %v572_v48, 17 }
  0x27   : > { %1067 = vmatmul.mubr.msk.f32.vlgmr.msra.gmra.mrb[6].mxu0 %vm288_vm2, %v464_v51  ;;  %1201 = vmatprep.subr.bf16.mxu1 %v1200_v10  ;;  %v1204_v51 = vpack.c.bf16 %v268_v44, %v267_v43 }
  0x28   : > { %1069 = vmatprep.mubr.msk.f32.mxu0 %vm1241_vm0, %v1242_v11  ;;  %1171 = vmatpush3.bf16.msra.mxu0 %v1168_v1  ;;  %v272_v1 = vld [vmem:[%s1500_s3 + $0xb8] sm:$0xff] }
  0x29   : > { %1173 = vmatprep.subr.bf16.mxu0 %v1172_v7  ;;  %v1212_v5 = vpack.c.bf16 %v272_v1, %v271_v0 }
  0x2b   : > { %1070 = vmatmul.mubr.msk.f32.gmra.mrb[8].mxu0 %vm288_vm2, %v466_v53 }
  0x2c   : > { %1072 = vmatprep.mubr.msk.f32.mxu0 %vm1241_vm0, %v1242_v11  ;;  %1175 = vmatpush3.bf16.msra.mxu0 %v1172_v7  ;;  %v261_v11 = vld [vmem:[%s1500_s3 + $0x60] sm:$0xff] }
  0x2d   : > { %v1176_v13 = vpack.c.bf16 %v262_v12, %v261_v11  ;;  %v933_v11 = vld [vmem:[%s1501_s4] ss:$0 sm:$0xff] }
  0x2f   : > { %1073 = vmatmul.mubr.msk.f32.gmra.mrb[10].mxu0 %vm288_vm2, %v465_v52  ;;  %1177 = vmatprep.subr.bf16.mxu0 %v1176_v13 }
  0x30   : > { %1179 = vmatpush3.bf16.msra.mxu0 %v1176_v13 }
  0x31   : > { %1181 = vmatprep.subr.bf16.mxu0 %v1180_v16 }
  0x34   : > { %1183 = vmatpush3.bf16.msra.mxu0 %v1180_v16 }
  0xea   : > { %v361_v17 = vpop.f32.mrb[0].mxu0 }
  0xeb   : > { %v1018_v18 = vpop.f32.mrb[1].mxu0  ;;  %v447_v19 = vpop.f32.mrb[0].mxu1 }
  0xec   : > { %v448_v20 = vadd.f32 %v447_v19, %v361_v17  ;;  %v1043_v21 = vpop.f32.mrb[1].mxu1 }
  0xee   : > { %v366_v22 = vpop.f32.mrb[2].mxu0 }
  0xef   : > { %v1021_v23 = vpop.f32.mrb[3].mxu0  ;;  %v452_v24 = vpop.f32.mrb[2].mxu1 }
  0xf0   : > { %v453_v25 = vadd.f32 %v452_v24, %v366_v22  ;;  %v1046_v26 = vpop.f32.mrb[3].mxu1 }
  0xf2   : > { %v371_v27 = vpop.f32.mrb[4].mxu0 }
  0xf3   : > { %v1024_v28 = vpop.f32.mrb[5].mxu0  ;;  %v457_v29 = vpop.f32.mrb[4].mxu1 }
  0xf4   : > { %v458_v30 = vadd.f32 %v457_v29, %v371_v27  ;;  %v1049_v31 = vpop.f32.mrb[5].mxu1 }
  0xfa   : > { %v539_v33 = vpop.f32.mrb[6].mxu0 }
  0xfb   : > { %v553_v36 = vadd.f32 %v539_v33, %v448_v20  ;;  %v1068_v37 = vpop.f32.mrb[7].mxu0 }
  0xfd   : > { %v563_v38 = vadd.f32 %v926_v34, %v553_v36 }
  0xfe   : > { %v544_v39 = vpop.f32.mrb[8].mxu0 }
  0xff   : > { %v566_v40 = vmax.f32 %v563_v38, 0.0  ;;  %v554_v41 = vadd.f32 %v544_v39, %v453_v25  ;;  %v1071_v42 = vpop.f32.mrb[9].mxu0 }
 0x101   : > { %v564_v45 = vadd.f32 %v926_v34, %v554_v41  ;;  %v588_v46 = vsel %vm573_vm4, %v566_v40, 0.0 }
 0x102   : > { %v549_v47 = vpop.f32.mrb[10].mxu0  ;;  %1110 = vmatprep.mubr.msk.f32.mxu1 %vm288_vm2, %v588_v46  ;;  %v594_v53 = vrot.slane %v588_v46, 1  ;;  %v757_v59 = vrot.slane %v588_v46, 2 }
 0x103   : > { %v567_v49 = vmax.f32 %v564_v45, 0.0  ;;  %v555_v50 = vadd.f32 %v549_v47, %v458_v30  ;;  %v1074_v52 = vpop.f32.mrb[11].mxu0 }
 0x105   : > { %v595_v56 = vrot.slane %v567_v49, 1  ;;  %v758_v57 = vrot.slane %v567_v49, 2  ;;  %v565_v58 = vadd.f32 %v926_v34, %v555_v50  ;;  %1111 = vmatmul.mubr.msk.f32.vlgmr.msra.gmra.mrb[6].mxu1 %vm288_vm2, %v567_v49 }
 0x106   : > { %1203 = vmatpush3.bf16.msra.mxu1 %v1200_v10 }
 0x107   : > { %v568_v60 = vmax.f32 %v565_v58, 0.0  ;;  %v596_v61 = vsel %vm282_vm1, %v594_v53, %v595_v56  ;;  %1205 = vmatprep.subr.bf16.mxu1 %v1204_v51  ;;  %v759_v62 = vsel %vm461_vm3, %v757_v59, %v758_v57 }
 0x108   : > { %1091 = vmatprep.mubr.msk.f32.mxu0 %vm288_vm2, %v596_v61  ;;  %1129 = vmatprep.mubr.msk.f32.mxu1 %vm288_vm2, %v759_v62 }
 0x109   : > { %v590_v2 = vsel %vm578_vm5, %v568_v60, 0.0 }
 0x10a   : > { %v597_v3 = vrot.slane %v590_v2, 1  ;;  %v760_v4 = vrot.slane %v590_v2, 2  ;;  %1207 = vmatpush3.bf16.msra.mxu1 %v1204_v51 }
 0x10b   : > { %1209 = vmatprep.subr.bf16.mxu1 %v1208_v63 }
 0x10c   : > { %v598_v6 = vsel %vm282_vm1, %v595_v56, %v597_v3  ;;  %v761_v7 = vsel %vm461_vm3, %v758_v57, %v760_v4 }
 0x10d   : > { %1092 = vmatmul.mubr.msk.f32.vlgmr.msra.gmra.mrb[12].mxu0 %vm288_vm2, %v598_v6 }
 0x10e   : > { %1211 = vmatpush3.bf16.msra.mxu1 %v1208_v63 }
 0x10f   : > { %1213 = vmatprep.subr.bf16.mxu1 %v1212_v5 }
 0x112   : > { %1215 = vmatpush3.bf16.msra.mxu1 %v1212_v5 }
 0x115   : > { %1130 = vmatmul.mubr.msk.f32.vlgmr.msra.gmra.mrb[6].mxu1 %vm288_vm2, %v761_v7 }
 0x1e0   : > { %v1093_v8 = vpop.f32.mrb[12].mxu0 }
 0x1e1   : > { %v669_v9 = vpop.f32.mrb[13].mxu0 }
 0x1e8   : > { %v1131_v10 = vpop.f32.mrb[6].mxu1 }
 0x1e9   : > { %v1216_v12 = vadd.f32 %v1131_v10, %v1093_v8  ;;  %v832_v13 = vpop.f32.mrb[7].mxu1 }
 0x1ea   : > { %v1217_v14 = vadd.f32 %v832_v13, %v669_v9 }
 0x1eb   : > { %v851_v15 = vadd.f32 %v1216_v12, %v933_v11 }
 0x1ec   : > { %v850_v16 = vadd.f32 %v1217_v14, %v933_v11 }
 0x1ed   : > { %853 = vst [vmem:[%s224_s10 + $0x8] sm:$0xff] %v851_v15 }
 0x1ee   : > { %852 = vst [vmem:[%s224_s10] sm:$0xff] %v850_v16 }
 0x1ef PF: > { %s15_s18 = sadd.s32 1, %s1238_s18  }
 0x1f0   : > { %p12_p4 = scmp.ge.s32.totalorder %s15_s18, 4  }
 0x1f2   :  { %14 = sbr.rel (!%p12_p4) target bundleno = 1 (0x1), region = 70 }

</bundles_post_ra>
